<compile_context>
chip_gen: v6e
topology: v6e:2x2x1
jax: 0.10.0
libtpu: 0.0.40
codegen_flags: <defaults>
</compile_context>

<pallas_src>
import functools

import jax
import jax.numpy as jnp
import numpy as np
from jax.experimental import pallas as pl
from jax.experimental.pallas import tpu as pltpu


def _make_kernel(K: int, Lt: int, C: int, Bt: int, write_carry: bool):
    def kernel(x_ref, w_ref, b_ref, o_ref, xcat_ref, carry_ref):
        # x_ref    : (Bt, C, Lt)            current L tile (NCL)
        # w_ref    : (C, K*C)               fused dense per-tap weights
        # b_ref    : (C, 1)                 bias
        # o_ref    : (Bt, C, Lt)            output tile
        # xcat_ref : (K*C, Bt*Lt)  VMEM     staged shifted-tap RHS
        # carry_ref: (Bt, C, max(K-1,1))    last K-1 columns of previous L tile
        if K > 1:
            @pl.when(pl.program_id(1) == 0)
            def _zero_carry():                # causal left zero-pad for tile 0
                carry_ref[...] = jnp.zeros_like(carry_ref)

        # Stage the K shifted views tap-by-tap into VMEM (bounded vreg
        # pressure), folding all Bt batches along the lane axis of X_cat.
        for b in range(Bt):
            x_b = x_ref[b]                    # (C, Lt)
            carry_b = carry_ref[b] if K > 1 else None
            col0 = b * Lt
            for k in range(K):
                s = K - 1 - k                 # left shift of tap k
                ncar = min(s, Lt)             # columns sourced from the carry
                nx = Lt - ncar                # columns sourced from this tile
                row0 = k * C
                if ncar > 0:
                    xcat_ref[row0:row0 + C, col0:col0 + ncar] = carry_b[:, k:k + ncar]
                if nx > 0:
                    xcat_ref[row0:row0 + C, col0 + ncar:col0 + Lt] = x_b[:, :nx]
            if write_carry:                   # halo for the next L tile
                carry_ref[b] = x_b[:, Lt - (K - 1):]

        # One MXU matmul for the whole tile (all taps & batches), f32 accumulate.
        y = jnp.dot(w_ref[...], xcat_ref[...], preferred_element_type=jnp.float32)
        y = y + b_ref[...]                    # single (C,1) broadcast (hoisted)
        for b in range(Bt):
            o_ref[b] = y[:, b * Lt:(b + 1) * Lt].astype(o_ref.dtype)

    return kernel


def _vmem_capacity_bytes() -> int:
    try:
        cap = int(getattr(pltpu.get_tpu_info(), "vmem_capacity_bytes"))
        if cap > 0:
            return cap
    except Exception:
        pass
    return 64 << 20                           # conservative: v7x per-core VMEM


def _estimate_vmem_bytes(Bt: int, C: int, Lt: int, K: int, itemsize: int) -> int:
    blk = Bt * C * Lt * itemsize
    need = 4 * blk                              # double-buffered x + out blocks
    need += 2 * C * K * C * itemsize            # w_cat (double-buffered)
    need += 2 * C * 4                           # bias
    need += Bt * C * max(K - 1, 1) * itemsize   # causal-carry scratch
    need += K * C * Bt * Lt * itemsize          # X_cat staging scratch
    need += C * Bt * Lt * 4                     # f32 matmul result
    return need


def _choose_tiles(B: int, C: int, L: int, K: int, itemsize: int):
    cap = max(_vmem_capacity_bytes(), 32 << 20)
    budget = int(0.45 * cap)          # headroom for compiler-internal scratch

    # Lane-dense L tiles (multiples of 128 dividing L), biggest first,
    # constrained by the per-generation VMEM budget (C-aware).
    cands = [c for c in (2048, 1024, 512, 256, 128) if L >= c and L % c == 0]
    Lt = None
    for c in cands:
        if _estimate_vmem_bytes(1, C, c, K, itemsize) <= budget:
            Lt = c
            break
    if Lt is None:
        # Short / non-128-aligned L, or huge C: fall back to whole sequence or
        # the minimum lane-dense tile (see large-C TODO in the header).
        Lt = cands[-1] if cands else L
    if L // Lt > 1 and Lt < K:        # carry correctness needs Lt >= K-1 cols
        Lt = L
    n_l = L // Lt

    # Batch tile: collapse small problems to amortize the ~0.35us/step overhead,
    # but keep >= 2 batch grid steps when possible so both v7x TCs get work.
    Bt = 1
    if n_l == 1 and B > 1:
        target = max(1, B // 2)
        for bt in range(target, 0, -1):
            if B % bt == 0 and _estimate_vmem_bytes(bt, C, Lt, K, itemsize) <= budget:
                Bt = bt
                break

    est = _estimate_vmem_bytes(Bt, C, Lt, K, itemsize)
    vmem_limit = max(32 << 20, 2 * est + (2 << 20))
    vmem_limit = min(vmem_limit, cap - (4 << 20))
    vmem_limit = max(vmem_limit, est + (2 << 20))
    return Bt, Lt, n_l, int(vmem_limit)


@functools.partial(jax.jit, static_argnames=("kernel_size", "groups"))
def conv1d_with_left_pad(x, weight, bias, *, kernel_size: int, groups: int):
    """x: (B, C, L); weight: (C, C//groups, K); bias: (C,). Returns (B, C, L)."""
    B, C, L = x.shape
    K = kernel_size
    g = C // groups

    # ---- fused dense weight W_cat[co, k*C + ci] (zeros across groups) ------
    co = jnp.arange(C)
    ci = jnp.arange(C)
    same_group = (co[:, None] // g) == (ci[None, :] // g)            # (C, C)
    w_gather = weight[co[:, None], (ci % g)[None, :], :]             # (Cout, Cin, K)
    w_dense = jnp.where(same_group[:, :, None], w_gather, 0.0)       # (Cout, Cin, K)
    w_cat = jnp.transpose(w_dense, (0, 2, 1)).reshape(C, K * C).astype(x.dtype)
    bias2d = bias.reshape(C, 1).astype(x.dtype)

    itemsize = jnp.dtype(x.dtype).itemsize
    Bt, Lt, n_l, vmem_limit = _choose_tiles(B, C, L, K, itemsize)
    write_carry = (K > 1) and (n_l > 1)

    # TODO(synk): for degenerate short-L configs (L < 128) the output stores are
    # lane-masked; packing batch into the lane axis would make them lane-dense.
    out = pl.pallas_call(
        _make_kernel(K, Lt, C, Bt, write_carry),
        out_shape=jax.ShapeDtypeStruct((B, C, L), x.dtype),
        grid_spec=pltpu.PrefetchScalarGridSpec(
            num_scalar_prefetch=0,
            grid=(B // Bt, n_l),
            in_specs=[
                pl.BlockSpec((Bt, C, Lt), lambda bi, li: (bi, 0, li)),
                pl.BlockSpec((C, K * C), lambda bi, li: (0, 0)),
                pl.BlockSpec((C, 1), lambda bi, li: (0, 0)),
            ],
            out_specs=pl.BlockSpec((Bt, C, Lt), lambda bi, li: (bi, 0, li)),
            scratch_shapes=[
                pltpu.VMEM((K * C, Bt * Lt), x.dtype),          # X_cat staging
                pltpu.VMEM((Bt, C, max(K - 1, 1)), x.dtype),    # causal carry
            ],
        ),
        compiler_params=pltpu.CompilerParams(
            # Batch tiles independent -> "parallel" (megacore); L tiles carry
            # the causal halo -> must stay "arbitrary" (sequential, in order).
            dimension_semantics=("parallel", "arbitrary"),
            vmem_limit_bytes=vmem_limit),
    )(x, w_cat, bias2d)
    return out


if __name__ == "__main__":
    # Small config consistent with the module: hidden_dim=32, kernel_size=3, groups=4
    B, C, L = 2, 32, 16
    K, GROUPS = 3, 4

    key = jax.random.PRNGKey(0)
    kx, kw, kb = jax.random.split(key, 3)
    x = jax.random.normal(kx, (B, C, L), dtype=jnp.float32)
    # Conv1d parameter shapes: (C_out, C_in/groups, K), (C_out,)
    fan_in = (C // GROUPS) * K
    bound = 1.0 / np.sqrt(fan_in)
    weight = jax.random.uniform(kw, (C, C // GROUPS, K),
                                minval=-bound, maxval=bound, dtype=jnp.float32)
    bias = jax.random.uniform(kb, (C,), minval=-bound, maxval=bound,
                              dtype=jnp.float32)

    out = conv1d_with_left_pad(x, weight, bias, kernel_size=K, groups=GROUPS)
    out = jax.block_until_ready(out)

    # Reference: XLA grouped causal conv (same semantics as the PyTorch module).
    ref = jax.lax.conv_general_dilated(
        x, weight, window_strides=(1,), padding=[(K - 1, 0)],
        dimension_numbers=("NCH", "OIH", "NCH"),
        feature_group_count=GROUPS) + bias[None, :, None]

    np.testing.assert_allclose(np.asarray(out), np.asarray(ref),
                               rtol=1e-5, atol=1e-5)
    assert out.shape == (B, C, L)
    print("KERNEL_OK")
</pallas_src>

<mosaic_0001>
module attributes {stable_mosaic.version = 11 : i64} {
  func.func @kernel(%arg0: i32, %arg1: i32, %arg2: memref<1x32x16xf32, #tpu.memory_space<vmem>>, %arg3: memref<32x96xf32, #tpu.memory_space<vmem>>, %arg4: memref<32x1xf32, #tpu.memory_space<vmem>>, %arg5: memref<1x32x16xf32, #tpu.memory_space<vmem>>, %arg6: memref<96x16xf32, #tpu.memory_space<vmem>>, %arg7: memref<1x32x2xf32, #tpu.memory_space<vmem>>) attributes {dimension_semantics = [#tpu.dimension_semantics<parallel>, #tpu.dimension_semantics<arbitrary>], iteration_bounds = array<i64: 2, 1>, scalar_prefetch = 0 : i64, scratch_operands = 2 : i64, tpu.core_type = #tpu.core_type<tc>, window_params = [{transform_indices = @transform_0, window_bounds = array<i64: 1, 32, 16>}, {pipeline_mode = #tpu.pipeline_mode<synchronous>, transform_indices = @transform_1, window_bounds = array<i64: 32, 96>}, {pipeline_mode = #tpu.pipeline_mode<synchronous>, transform_indices = @transform_2, window_bounds = array<i64: 32, 1>}, {transform_indices = @transform_3, window_bounds = array<i64: 1, 32, 16>}]} {
    %c0_i32 = arith.constant 0 : i32
    %0 = arith.cmpi eq, %arg1, %c0_i32 : i32
    %1 = arith.extui %0 : i1 to i32
    %c0_i32_0 = arith.constant 0 : i32
    %2 = arith.cmpi ne, %1, %c0_i32_0 : i32
    scf.if %2 {
      %cst_21 = arith.constant 0.000000e+00 : f32
      %24 = vector.broadcast %cst_21 : f32 to vector<1x32x2xf32>
      %c0_22 = arith.constant 0 : index
      %c0_23 = arith.constant 0 : index
      %c0_24 = arith.constant 0 : index
      %25 = vector.load %arg7[%c0_22, %c0_23, %c0_24] : memref<1x32x2xf32, #tpu.memory_space<vmem>>, vector<1x32x2xf32>
      tpu.vector_store %arg7[%c0_22, %c0_23, %c0_24], %24 {strides = array<i32>} : memref<1x32x2xf32, #tpu.memory_space<vmem>>, vector<1x32x2xf32>,
    } else {
    }
    %c0 = arith.constant 0 : index
    %c0_1 = arith.constant 0 : index
    %c0_2 = arith.constant 0 : index
    %3 = vector.load %arg2[%c0, %c0_1, %c0_2] : memref<1x32x16xf32, #tpu.memory_space<vmem>>, vector<1x32x16xf32>
    %4 = vector.shape_cast %3 : vector<1x32x16xf32> to vector<32x16xf32>
    %c0_3 = arith.constant 0 : index
    %c0_4 = arith.constant 0 : index
    %c0_5 = arith.constant 0 : index
    %5 = vector.load %arg7[%c0_3, %c0_4, %c0_5] : memref<1x32x2xf32, #tpu.memory_space<vmem>>, vector<1x32x2xf32>
    %6 = vector.shape_cast %5 : vector<1x32x2xf32> to vector<32x2xf32>
    %c0_6 = arith.constant 0 : index
    %c0_7 = arith.constant 0 : index
    %7 = vector.load %arg6[%c0_6, %c0_7] : memref<96x16xf32, #tpu.memory_space<vmem>>, vector<32x2xf32>
    tpu.vector_store %arg6[%c0_6, %c0_7], %6 {strides = array<i32>} : memref<96x16xf32, #tpu.memory_space<vmem>>, vector<32x2xf32>,
    %8 = vector.extract_strided_slice %4 {offsets = [0, 0], sizes = [32, 14], strides = [1, 1]} : vector<32x16xf32> to vector<32x14xf32>
    %c0_8 = arith.constant 0 : index
    %c2 = arith.constant 2 : index
    %9 = vector.load %arg6[%c0_8, %c2] : memref<96x16xf32, #tpu.memory_space<vmem>>, vector<32x14xf32>
    tpu.vector_store %arg6[%c0_8, %c2], %8 {strides = array<i32>} : memref<96x16xf32, #tpu.memory_space<vmem>>, vector<32x14xf32>,
    %10 = vector.extract_strided_slice %6 {offsets = [0, 1], sizes = [32, 1], strides = [1, 1]} : vector<32x2xf32> to vector<32x1xf32>
    %c32 = arith.constant 32 : index
    %c0_9 = arith.constant 0 : index
    %11 = vector.load %arg6[%c32, %c0_9] : memref<96x16xf32, #tpu.memory_space<vmem>>, vector<32x1xf32>
    tpu.vector_store %arg6[%c32, %c0_9], %10 {strides = array<i32>} : memref<96x16xf32, #tpu.memory_space<vmem>>, vector<32x1xf32>,
    %12 = vector.extract_strided_slice %4 {offsets = [0, 0], sizes = [32, 15], strides = [1, 1]} : vector<32x16xf32> to vector<32x15xf32>
    %c32_10 = arith.constant 32 : index
    %c1 = arith.constant 1 : index
    %13 = vector.load %arg6[%c32_10, %c1] : memref<96x16xf32, #tpu.memory_space<vmem>>, vector<32x15xf32>
    tpu.vector_store %arg6[%c32_10, %c1], %12 {strides = array<i32>} : memref<96x16xf32, #tpu.memory_space<vmem>>, vector<32x15xf32>,
    %c64 = arith.constant 64 : index
    %c0_11 = arith.constant 0 : index
    %14 = vector.load %arg6[%c64, %c0_11] : memref<96x16xf32, #tpu.memory_space<vmem>>, vector<32x16xf32>
    tpu.vector_store %arg6[%c64, %c0_11], %4 {strides = array<i32>} : memref<96x16xf32, #tpu.memory_space<vmem>>, vector<32x16xf32>,
    %c0_12 = arith.constant 0 : index
    %c0_13 = arith.constant 0 : index
    %15 = vector.load %arg3[%c0_12, %c0_13] : memref<32x96xf32, #tpu.memory_space<vmem>>, vector<32x96xf32>
    %c0_14 = arith.constant 0 : index
    %c0_15 = arith.constant 0 : index
    %16 = vector.load %arg6[%c0_14, %c0_15] : memref<96x16xf32, #tpu.memory_space<vmem>>, vector<96x16xf32>
    %cst = arith.constant dense<0.000000e+00> : vector<32x16xf32>
    %17 = tpu.matmul %15, %16, %cst {dimension_numbers = #tpu.dot_dimension_numbers<[1], [0], [0], [1], [0, 0, 1, 1], [], []>} : vector<32x96xf32>, vector<96x16xf32>, vector<32x16xf32> -> vector<32x16xf32>
    %c0_16 = arith.constant 0 : index
    %c0_17 = arith.constant 0 : index
    %18 = vector.load %arg4[%c0_16, %c0_17] : memref<32x1xf32, #tpu.memory_space<vmem>>, vector<32x1xf32>
    %19 = vector.broadcast %18 : vector<32x1xf32> to vector<32x16xf32>
    %20 = arith.addf %17, %19 : vector<32x16xf32>
    %c0_18 = arith.constant 0 : index
    %c0_19 = arith.constant 0 : index
    %c0_20 = arith.constant 0 : index
    %21 = vector.load %arg5[%c0_18, %c0_19, %c0_20] : memref<1x32x16xf32, #tpu.memory_space<vmem>>, vector<1x32x16xf32>
    %22 = vector.shape_cast %21 : vector<1x32x16xf32> to vector<32x16xf32>
    %23 = vector.shape_cast %20 : vector<32x16xf32> to vector<1x32x16xf32>
    tpu.vector_store %arg5[%c0_18, %c0_19, %c0_20], %23 {strides = array<i32>} : memref<1x32x16xf32, #tpu.memory_space<vmem>>, vector<1x32x16xf32>,
    return
  }
  func.func @transform_0(%arg0: i32, %arg1: i32) -> (i32, i32, i32) {
    %c0_i32 = arith.constant 0 : i32
    %c0_i32_0 = arith.constant 0 : i32
    return %arg0, %c0_i32, %arg1 : i32, i32, i32
  }
  func.func @transform_1(%arg0: i32, %arg1: i32) -> (i32, i32) {
    %c0_i32 = arith.constant 0 : i32
    %c0_i32_0 = arith.constant 0 : i32
    %c0_i32_1 = arith.constant 0 : i32
    return %c0_i32, %c0_i32_0 : i32, i32
  }
  func.func @transform_2(%arg0: i32, %arg1: i32) -> (i32, i32) {
    %c0_i32 = arith.constant 0 : i32
    %c0_i32_0 = arith.constant 0 : i32
    %c0_i32_1 = arith.constant 0 : i32
    return %c0_i32, %c0_i32_0 : i32, i32
  }
  func.func @transform_3(%arg0: i32, %arg1: i32) -> (i32, i32, i32) {
    %c0_i32 = arith.constant 0 : i32
    %c0_i32_0 = arith.constant 0 : i32
    return %arg0, %c0_i32, %arg1 : i32, i32, i32
  }
}

</mosaic_0001>

<bundles_post_ra>
// kernel: conv1d_with_left_pad.1
= control target key start
LH: loop header
LB: loop body
LE: loop exit
PB: predicated region body
PF: predicated region fallthrough
CT: control target
= control target key end

     0   :  { %s680_s12 = smov 0   ;;  %s682_s13 = smov 0   ;;  %s772_s0 = inlined_call_operand.vmem [shape: f32[2,32,16], index: 0, kind: input, shape index: {}]   ;;  %s773_s1 = inlined_call_operand.vmem [shape: f32[32,96], index: 1, kind: input, shape index: {}]   ;;  %s774_s2 = inlined_call_operand.vmem [shape: f32[32,1], index: 2, kind: input, shape index: {}]   ;;  %s775_s3 = inlined_call_operand.vmem [shape: f32[2,32,16], index: 3, kind: output, shape index: {}]  }
   0x1   :  { %s684_s14 = smov 0  }
   0x2 LB: > { %s25_s15 = sadd.s32 1, %s649_s13  ;;  %p517_p0 = scmp.ge.s32.totalorder %s653_s14, 1  ;;  %s653_s14 = sphi %s684_s14, %s13_s14   ;;  %s649_s13 = sphi %s682_s13, %s777_s13   ;;  %s645_s12 = sphi %s680_s12, %s776_s12  }
   0x3   : > { %p27_p1 = scmp.ge.s32.totalorder %s25_s15, 2  ;;  %p156_p2 = scmp.lt.s32.totalorder %s653_s14, 3 }
   0x5   : > { %s779_s15 = smov (%p27_p1, %s25_s15), 0  ;;  %p157_p3 = pnand %p517_p0, %p156_p2 }
   0x6   : > { %p186_p4 = scmp.lt.s32.totalorder (!%p157_p3), %s645_s12, 1  ;;  %s656_s20 = smov (!%p157_p3), 1  }
   0x7   : > { %160 = sbr.rel (%p157_p3) target bundleno = 362 (0x16a), region = 32  ;;  %s657_s21 = smov (!%p157_p3), 127  }
   0x8   : > { %s658_s22 = smov (!%p157_p3), 2  }
   0xc   : > { %vm206_vm0 = vcmask 15360   ;;  %v655_v0 = vmov 0.0   ;;  %s781_s12 = smov (!%p186_p4, %s645_s12), 1  ;;  %vm283_vm1 = vcmask 130048   ;;  %v288_v13 = vld [vmem:[%s773_s1] sm:$0xff]  ;;  %vm328_vm2 = vcmask 785408  }
   0xd   : > { %210 = vst.msk [vmem:[#allocation3 + $0x18] sm:$0xff] %vm206_vm0, %v655_v0  ;;  %207 = vst.msk [vmem:[#allocation3] sm:$0xff] %vm206_vm0, %v655_v0  ;;  %s528_s16 = sshll.u32 %s781_s12, 5  ;;  %v290_v14 = vld [vmem:[%s773_s1 + $0x10] sm:$0xff]  ;;  %570 = vmatprep.mubr.msk.f32.mxu0 %vm328_vm2, %v288_v13  ;;  %v659_v15 = vmov 0   ;;  %v304_v16 = vld [vmem:[%s774_s2] sm:$0xff] }
   0xe   : > { %208 = vst.msk [vmem:[#allocation3 + $0x8] sm:$0xff] %vm206_vm0, %v655_v0  ;;  %209 = vst.msk [vmem:[#allocation3 + $0x10] sm:$0xff] %vm206_vm0, %v655_v0  ;;  %s193_s19 = scalar_lea.vmem %s772_s0, %s528_s16  ;;  %573 = vmatprep.mubr.msk.f32.mxu1 %vm328_vm2, %v290_v14  ;;  %630 = vset.pattern.permute.xlu1 %v659_v15  ;;  %v305_v17 = vld [vmem:[%s774_s2 + $0x8] sm:$0xff]  ;;  %v307_v18 = vld [vmem:[%s774_s2 + $0x18] sm:$0xff]  ;;  %vm261_vm3 = vcmask 7168   ;;  %vm278_vm4 = vcmask 130056  }
   0xf   : > { %v214_v1 = vld [vmem:[%s193_s19 + $0x18] sm:$0xff]  ;;  %v213_v2 = vld [vmem:[%s193_s19 + $0x10] sm:$0xff]  ;;  %v212_v3 = vld [vmem:[%s193_s19 + $0x8] sm:$0xff]  ;;  %629 = vset.pattern.permute.xlu0 %v659_v15  ;;  %vm240_vm5 = vcmask 130064  }
  0x10   : > { %272 = vrot.lane.b32.xlu0 %v214_v1, %s656_s20  ;;  %287 = vst.msk [vmem:[#allocation2 + $0x58] sm:$0xff] %vm283_vm1, %v214_v1  ;;  %270 = vrot.lane.b32.xlu1 %v213_v2, %s656_s20  ;;  %286 = vst.msk [vmem:[#allocation2 + $0x50] sm:$0xff] %vm283_vm1, %v213_v2  ;;  %v211_v4 = vld [vmem:[%s193_s19] sm:$0xff]  ;;  %v306_v19 = vld [vmem:[%s774_s2 + $0x10] sm:$0xff]  ;;  %s201_s19 = scalar_lea.vmem %s775_s3, %s528_s16 }
  0x11   : > { %285 = vst.msk [vmem:[#allocation2 + $0x48] sm:$0xff] %vm283_vm1, %v212_v3  ;;  %284 = vst.msk [vmem:[#allocation2 + $0x40] sm:$0xff] %vm283_vm1, %v211_v4  ;;  %v289_v40 = vld [vmem:[%s773_s1 + $0x8] sm:$0xff]  ;;  %v291_v41 = vld [vmem:[%s773_s1 + $0x18] sm:$0xff] }
  0x14   : > { %v218_v5 = vld [vmem:[#allocation3 + $0x18] sm:$0xff]  ;;  %v215_v8 = vld [vmem:[#allocation3] sm:$0xff] }
  0x15   : > { %v217_v6 = vld [vmem:[#allocation3 + $0x10] sm:$0xff]  ;;  %v216_v7 = vld [vmem:[#allocation3 + $0x8] sm:$0xff]  ;;  %223 = vst.msk [vmem:[#allocation2 + $0x18] sm:$0xff] %vm206_vm0, %v218_v5  ;;  %220 = vst.msk [vmem:[#allocation2] sm:$0xff] %vm206_vm0, %v215_v8  ;;  %255 = vrot.lane.b32.xlu0 %v218_v5, %s657_s21 }
  0x16   : > { %222 = vst.msk [vmem:[#allocation2 + $0x10] sm:$0xff] %vm206_vm0, %v217_v6  ;;  %221 = vst.msk [vmem:[#allocation2 + $0x8] sm:$0xff] %vm206_vm0, %v216_v7  ;;  %253 = vrot.lane.b32.xlu1 %v217_v6, %s657_s21 }
  0x17   : > { %v303_v9 = vld [vmem:[#allocation2 + $0x58] sm:$0xff]  ;;  %v302_v10 = vld [vmem:[#allocation2 + $0x50] sm:$0xff] }
  0x18   : > { %546 = vmatprep.subr.mxu0 %v303_v9  ;;  %576 = vmatprep.subr.mxu1 %v303_v9  ;;  %v301_v11 = vld [vmem:[#allocation2 + $0x48] sm:$0xff]  ;;  %v300_v12 = vld [vmem:[#allocation2 + $0x40] sm:$0xff] }
  0x19   : > { %251 = vrot.lane.b32.xlu0 %v216_v7, %s657_s21  ;;  %547 = vmatpush3.msra.mxu0 %v303_v9 }
  0x1a   : > { %268 = vrot.lane.b32.xlu1 %v212_v3, %s656_s20  ;;  %588 = vmatpush3.msra.mxu1 %v303_v9 }
  0x1b   : > { %548 = vmatprep.subr.mxu0 %v302_v10  ;;  %577 = vmatprep.subr.mxu1 %v302_v10 }
  0x1c   : > { %549 = vmatpush3.msra.mxu0 %v302_v10  ;;  %589 = vmatpush3.msra.mxu1 %v302_v10 }
  0x1d   : > { %249 = vrot.lane.b32.xlu0 %v215_v8, %s657_s21  ;;  %550 = vmatprep.subr.mxu0 %v301_v11 }
  0x1e   : > { %266 = vrot.lane.b32.xlu1 %v211_v4, %s656_s20  ;;  %578 = vmatprep.subr.mxu1 %v301_v11 }
  0x1f   : > { %551 = vmatpush3.msra.mxu0 %v301_v11  ;;  %590 = vmatpush3.msra.mxu1 %v301_v11 }
  0x20   : > { %552 = vmatprep.subr.mxu0 %v300_v12  ;;  %579 = vmatprep.subr.mxu1 %v300_v12 }
  0x21   : > { %234 = vrot.lane.b32.xlu0 %v214_v1, %s658_s22  ;;  %553 = vmatpush3.msra.mxu0 %v300_v12 }
  0x22   : > { %232 = vrot.lane.b32.xlu1 %v213_v2, %s658_s22  ;;  %591 = vmatpush3.msra.mxu1 %v300_v12 }
  0x25   : > { %230 = vrot.lane.b32.xlu0 %v212_v3, %s658_s22 }
  0x26   : > { %228 = vrot.lane.b32.xlu1 %v211_v4, %s658_s22 }
  0x29   : > { %310 = vperm.xlu0 %629, %v304_v16  }
  0x2a   : > { %315 = vperm.xlu1 %630, %v305_v17  }
  0x2d   : > { %325 = vperm.xlu0 %629, %v307_v18  }
  0x2e   : > { %320 = vperm.xlu1 %630, %v306_v19  }
  0x82   : > { %v273_v20 = vpop.permute.xlu0 %272  ;;  %v271_v21 = vpop.permute.xlu1 %270 }
  0x87   : > { %v256_v22 = vpop.permute.xlu0 %255 }
  0x88   : > { %v254_v23 = vpop.permute.xlu1 %253  ;;  %265 = vst.msk [vmem:[#allocation2 + $0x38] sm:$0xff] %vm261_vm3, %v256_v22 }
  0x89   : > { %264 = vst.msk [vmem:[#allocation2 + $0x30] sm:$0xff] %vm261_vm3, %v254_v23 }
  0x8a   : > { %282 = vst.msk [vmem:[#allocation2 + $0x38] sm:$0xff] %vm278_vm4, %v273_v20  ;;  %281 = vst.msk [vmem:[#allocation2 + $0x30] sm:$0xff] %vm278_vm4, %v271_v21 }
  0x8b   : > { %v252_v24 = vpop.permute.xlu0 %251 }
  0x8c   : > { %v269_v25 = vpop.permute.xlu1 %268  ;;  %263 = vst.msk [vmem:[#allocation2 + $0x28] sm:$0xff] %vm261_vm3, %v252_v24 }
  0x8d   : > { %280 = vst.msk [vmem:[#allocation2 + $0x28] sm:$0xff] %vm278_vm4, %v269_v25 }
  0x8f   : > { %v250_v26 = vpop.permute.xlu0 %249 }
  0x90   : > { %v267_v27 = vpop.permute.xlu1 %266  ;;  %262 = vst.msk [vmem:[#allocation2 + $0x20] sm:$0xff] %vm261_vm3, %v250_v26 }
  0x91   : > { %v299_v28 = vld [vmem:[#allocation2 + $0x38] sm:$0xff]  ;;  %279 = vst.msk [vmem:[#allocation2 + $0x20] sm:$0xff] %vm278_vm4, %v267_v27  ;;  %v298_v29 = vld [vmem:[#allocation2 + $0x30] sm:$0xff] }
  0x92   : > { %554 = vmatprep.subr.mxu0 %v299_v28  ;;  %580 = vmatprep.subr.mxu1 %v299_v28 }
  0x93   : > { %555 = vmatpush3.msra.mxu0 %v299_v28  ;;  %592 = vmatpush3.msra.mxu1 %v299_v28  ;;  %v235_v30 = vpop.permute.xlu0 %234 }
  0x94   : > { %556 = vmatprep.subr.mxu0 %v298_v29  ;;  %581 = vmatprep.subr.mxu1 %v298_v29  ;;  %v233_v31 = vpop.permute.xlu1 %232  ;;  %244 = vst.msk [vmem:[#allocation2 + $0x18] sm:$0xff] %vm240_vm5, %v235_v30  ;;  %v297_v32 = vld [vmem:[#allocation2 + $0x28] sm:$0xff] }
  0x95   : > { %557 = vmatpush3.msra.mxu0 %v298_v29  ;;  %593 = vmatpush3.msra.mxu1 %v298_v29  ;;  %243 = vst.msk [vmem:[#allocation2 + $0x10] sm:$0xff] %vm240_vm5, %v233_v31 }
  0x96   : > { %558 = vmatprep.subr.mxu0 %v297_v32  ;;  %582 = vmatprep.subr.mxu1 %v297_v32 }
  0x97   : > { %559 = vmatpush3.msra.mxu0 %v297_v32  ;;  %594 = vmatpush3.msra.mxu1 %v297_v32  ;;  %v231_v33 = vpop.permute.xlu0 %230 }
  0x98   : > { %v229_v34 = vpop.permute.xlu1 %228  ;;  %242 = vst.msk [vmem:[#allocation2 + $0x8] sm:$0xff] %vm240_vm5, %v231_v33  ;;  %v296_v35 = vld [vmem:[#allocation2 + $0x20] sm:$0xff] }
  0x99   : > { %241 = vst.msk [vmem:[#allocation2] sm:$0xff] %vm240_vm5, %v229_v34  ;;  %560 = vmatprep.subr.mxu0 %v296_v35  ;;  %583 = vmatprep.subr.mxu1 %v296_v35 }
  0x9a   : > { %561 = vmatpush3.msra.mxu0 %v296_v35  ;;  %595 = vmatpush3.msra.mxu1 %v296_v35 }
  0x9b   : > { %v295_v36 = vld [vmem:[#allocation2 + $0x18] sm:$0xff] }
  0x9c   : > { %v294_v37 = vld [vmem:[#allocation2 + $0x10] sm:$0xff]  ;;  %562 = vmatprep.subr.mxu0 %v295_v36  ;;  %584 = vmatprep.subr.mxu1 %v295_v36 }
  0x9d   : > { %563 = vmatpush3.msra.mxu0 %v295_v36  ;;  %596 = vmatpush3.msra.mxu1 %v295_v36 }
  0x9e   : > { %564 = vmatprep.subr.mxu0 %v294_v37  ;;  %585 = vmatprep.subr.mxu1 %v294_v37 }
  0x9f   : > { %565 = vmatpush3.msra.mxu0 %v294_v37  ;;  %597 = vmatpush3.msra.mxu1 %v294_v37  ;;  %v293_v38 = vld [vmem:[#allocation2 + $0x8] sm:$0xff] }
  0xa0   : > { %v292_v39 = vld [vmem:[#allocation2] sm:$0xff]  ;;  %566 = vmatprep.subr.mxu0 %v293_v38  ;;  %586 = vmatprep.subr.mxu1 %v293_v38 }
  0xa1   : > { %567 = vmatpush3.msra.mxu0 %v293_v38  ;;  %598 = vmatpush3.msra.mxu1 %v293_v38 }
  0xa2   : > { %568 = vmatprep.subr.mxu0 %v292_v39  ;;  %587 = vmatprep.subr.mxu1 %v292_v39 }
  0xa3   : > { %569 = vmatpush3.msra.mxu0 %v292_v39  ;;  %599 = vmatpush3.msra.mxu1 %v292_v39 }
  0xa4   : > { %571 = vmatmul.mubr.msk.f32.vlgmr.msra.gmra.mxu0 %vm328_vm2, %v289_v40  ;;  %574 = vmatmul.mubr.msk.f32.vlgmr.msra.gmra.mxu1 %vm328_vm2, %v291_v41  ;;  %v311_v42 = vpop.permute.xlu0 %310 }
  0xa5   : > { %v316_v43 = vpop.permute.xlu1 %315 }
  0xa8   : > { %v326_v44 = vpop.permute.xlu0 %325 }
  0xa9   : > { %v321_v47 = vpop.permute.xlu1 %320 }
 0x164   : > { %v572_v45 = vpop.f32.mrf.mxu0  ;;  %v575_v46 = vpop.f32.mrf.mxu1 }
 0x165   : > { %v413_v48 = vadd.f32 %v572_v45, %v316_v43  ;;  %v423_v49 = vadd.f32 %v575_v46, %v326_v44 }
 0x166   : > { %v407_v50 = vpop.f32.mrf.mxu0  ;;  %v417_v51 = vpop.f32.mrf.mxu1 }
 0x167   : > { %427 = vst.msk [vmem:[%s201_s19 + $0x8] sm:$0xff] %vm283_vm1, %v413_v48  ;;  %429 = vst.msk [vmem:[%s201_s19 + $0x18] sm:$0xff] %vm283_vm1, %v423_v49  ;;  %v408_v52 = vadd.f32 %v407_v50, %v311_v42  ;;  %v418_v53 = vadd.f32 %v417_v51, %v321_v47 }
 0x169   : > { %426 = vst.msk [vmem:[%s201_s19] sm:$0xff] %vm283_vm1, %v408_v52  ;;  %428 = vst.msk [vmem:[%s201_s19 + $0x10] sm:$0xff] %vm283_vm1, %v418_v53 }
 0x16a PF: > { %s13_s14 = sadd.s32 1, %s653_s14   ;;  %s776_s12 = smov %s649_s13 }
 0x16b   : > { %p10_p5 = scmp.ge.s32.totalorder %s13_s14, 4   ;;  %s777_s13 = smov %s779_s15 }
 0x16d   :  { %12 = sbr.rel (!%p10_p5) target bundleno = 2 (0x2), region = 66 }

</bundles_post_ra>
